<compile_context>
chip_gen: v5e
topology: v5e:2x2
jax: 0.10.0
libtpu: 0.0.40
codegen_flags: <defaults>
</compile_context>

<pallas_src>
from functools import partial

import jax
import jax.numpy as jnp
from jax.experimental import pallas as pl
from jax.experimental.pallas import tpu as pltpu


def _round_up(v, m):
    return (v + m - 1) // m * m


def _tpu_generation():
    """Best-effort TPU generation (5/6/7) from the device kind string."""
    try:
        kind = jax.devices()[0].device_kind.lower()
    except Exception:
        return None
    for ver in (7, 6, 5, 4):
        if f"v{ver}" in kind:
            return ver
    return None


def _vmem_budget_bytes(gen):
    """Per-core VMEM capacity with ~25% headroom (v7x: 64 MiB physical)."""
    cap = None
    try:
        cap = int(getattr(pltpu.get_tpu_info(), "vmem_capacity_bytes"))
    except Exception:
        cap = None
    if not cap:
        cap = (64 << 20) if (gen is not None and gen >= 7) else (128 << 20)
    return (cap * 3) // 4


def _block_vmem_bytes(bt, n, f, hp, md, out_bytes):
    """Rough per-step VMEM footprint (double-buffered I/O + f32 intermediates)."""
    rows = bt * n
    return (2 * (rows * f * md + rows * rows * md)            # x, block-diag adj
            + (f * hp + hp * hp) * md + 2 * hp * 4            # resident weights/bias
            + 2 * (rows * hp * out_bytes + 2 * bt * hp * 4)   # h2, gh1, gh2
            + 6 * rows * hp * 4)                              # f32 intermediates margin


def _pick_graphs_per_step(B, N, F, Hp, md, out_bytes, budget, target_rows, min_grid):
    # Bt must divide B, and (Bt % 8 == 0 or Bt == B) so every output block keeps
    # its second-minor dim 8-aligned (or full-extent).
    divisors = [d for d in range(1, B + 1) if B % d == 0 and (d == B or d % 8 == 0)]
    fitting = [d for d in divisors if _block_vmem_bytes(d, N, F, Hp, md, out_bytes) <= budget]
    if not fitting:
        fitting = [min(divisors)]
    # Prefer a grid that can shard across all TensorCores (v7x: grid >= 2), then
    # the largest Bt whose fused matmul stays within target_rows MXU rows.
    pref = [d for d in fitting if B // d >= min_grid] or fitting
    small = [d for d in pref if d * N <= target_rows]
    return max(small) if small else min(pref)


def encoder_kernel(x_ref, adj_ref, w1_ref, b1_ref, w2_ref, b2_ref,
                   h2_ref, gh1_ref, gh2_ref, *, graphs_per_step, nodes):
    # One grid step processes `graphs_per_step` graphs packed into a single
    # (rows, .) slab; adj_ref holds their block-diagonal adjacency, so each GCN
    # aggregation is one lane-dense MXU matmul instead of per-graph tiny matmuls.
    x = x_ref[...]          # (rows, F)      matmul dtype
    adj = adj_ref[...]      # (rows, rows)   matmul dtype, block-diagonal
    w1 = w1_ref[...]        # (F, Hp)
    w2 = w2_ref[...]        # (Hp, Hp)
    b1 = b1_ref[...]        # (1, Hp)  f32
    b2 = b2_ref[...]        # (1, Hp)  f32

    # Layer 1: fused support matmul + fused block-diagonal aggregation.
    s1 = jnp.dot(x, w1, preferred_element_type=jnp.float32)
    h1 = jnp.maximum(
        jnp.dot(adj, s1.astype(adj.dtype), preferred_element_type=jnp.float32) + b1,
        0.0)

    # Dropout: module evaluated in inference mode -> identity.
    # TODO(synk): training-mode dropout would use pltpu.prng_seed / prng_random_bits.

    # Layer 2.
    s2 = jnp.dot(h1.astype(w2.dtype), w2, preferred_element_type=jnp.float32)
    h2 = jnp.maximum(
        jnp.dot(adj, s2.astype(adj.dtype), preferred_element_type=jnp.float32) + b2,
        0.0)

    h2_ref[...] = h2.astype(h2_ref.dtype)

    # Graph-level pooling (sum over the node axis). The concat happens in the
    # wrapper so both stores here are full-lane-width (Hp = multiple of 128).
    hp = h1.shape[-1]
    gh1_ref[...] = jnp.sum(h1.reshape(graphs_per_step, nodes, hp), axis=1).astype(gh1_ref.dtype)
    gh2_ref[...] = jnp.sum(h2.reshape(graphs_per_step, nodes, hp), axis=1).astype(gh2_ref.dtype)


def encoder_forward(x, adj, w1, b1, w2, b2, *, graphs_per_step=None,
                    matmul_dtype=jnp.bfloat16, h2_dtype=jnp.float32):
    B, N, F = x.shape
    H = w1.shape[1]
    Hp = _round_up(H, 128)        # lane-align the hidden dim only (F stays unpadded)
    md = jnp.dtype(matmul_dtype).itemsize
    ob = jnp.dtype(h2_dtype).itemsize

    gen = _tpu_generation()
    budget = _vmem_budget_bytes(gen)
    min_grid = 2 if (gen is not None and gen >= 7) else 1    # v7x: 2 TensorCores/chip
    target_rows = 128 if gen == 5 else 256                   # MXU rows per fused matmul

    if graphs_per_step is None:
        graphs_per_step = _pick_graphs_per_step(B, N, F, Hp, md, ob, budget,
                                                target_rows, min_grid)
    Bt = graphs_per_step
    assert B % Bt == 0, "batch must be divisible by graphs_per_step"
    assert Bt == B or Bt % 8 == 0, "graphs_per_step must be B or a multiple of 8"
    G = B // Bt
    rows = Bt * N

    # Inputs: x flattened (no F padding — full-dim F block is legal, and this cuts
    # the x HBM stream ~8x vs padding to 128 lanes).
    xp = x.reshape(B * N, F).astype(matmul_dtype)

    # Block-diagonal adjacency per grid step: entry [g, b*N+i, c*N+j] =
    # adj[g*Bt+b, i, j] if b == c else 0.  Lane-dense (last dim = rows).
    adj_g = adj.reshape(G, Bt, N, N).astype(matmul_dtype)
    eye_bt = jnp.eye(Bt, dtype=matmul_dtype)
    adj_bd = (adj_g[:, :, :, None, :] * eye_bt[None, :, None, :, None]
              ).reshape(G * rows, rows)

    # Zero-padding of W columns / W2 rows / biases is what makes the wrapper-side
    # un-padding exact: padded columns of s/h stay 0 through relu(0 + 0) = 0.
    # (Do NOT change these pads to anything non-zero.)
    w1p = jnp.pad(w1, ((0, 0), (0, Hp - H))).astype(matmul_dtype)
    w2p = jnp.pad(w2, ((0, Hp - H), (0, Hp - H))).astype(matmul_dtype)
    b1p = jnp.pad(b1, ((0, 0), (0, Hp - H))).astype(jnp.float32)
    b2p = jnp.pad(b2, ((0, 0), (0, Hp - H))).astype(jnp.float32)

    # VMEM limit: need-with-margin, clamped to the chip's capacity budget.
    need = _block_vmem_bytes(Bt, N, F, Hp, md, ob)
    vmem_limit = int(min(budget, max(need + (2 << 20), 32 << 20)))

    flops = (2 * B * N * F * Hp                 # x @ W1
             + 2 * B * N * Hp * Hp              # h1 @ W2
             + 2 * 2 * G * rows * rows * Hp)    # two block-diag aggregations
    bytes_accessed = (B * N * F * md + G * rows * rows * md
                      + (F * Hp + Hp * Hp) * md + 2 * Hp * 4
                      + B * N * Hp * ob + 2 * B * Hp * 4)
    cost = pl.CostEstimate(flops=int(flops), transcendentals=0,
                           bytes_accessed=int(bytes_accessed))

    out_shapes = (
        jax.ShapeDtypeStruct((B * N, Hp), h2_dtype),     # h2 (padded, flattened)
        jax.ShapeDtypeStruct((B, Hp), jnp.float32),      # sum(h1, nodes) (padded)
        jax.ShapeDtypeStruct((B, Hp), jnp.float32),      # sum(h2, nodes) (padded)
    )

    grid_spec = pltpu.PrefetchScalarGridSpec(
        num_scalar_prefetch=0,
        grid=(G,),
        in_specs=[
            pl.BlockSpec((rows, F), lambda g: (g, 0)),       # x slab
            pl.BlockSpec((rows, rows), lambda g: (g, 0)),    # block-diag adj
            pl.BlockSpec((F, Hp), lambda g: (0, 0)),         # W1 (grid-invariant)
            pl.BlockSpec((1, Hp), lambda g: (0, 0)),         # b1
            pl.BlockSpec((Hp, Hp), lambda g: (0, 0)),        # W2
            pl.BlockSpec((1, Hp), lambda g: (0, 0)),         # b2
        ],
        out_specs=[
            pl.BlockSpec((rows, Hp), lambda g: (g, 0)),
            pl.BlockSpec((Bt, Hp), lambda g: (g, 0)),
            pl.BlockSpec((Bt, Hp), lambda g: (g, 0)),
        ],
    )

    h2_pad, gh1, gh2 = pl.pallas_call(
        partial(encoder_kernel, graphs_per_step=Bt, nodes=N),
        out_shape=out_shapes,
        grid_spec=grid_spec,
        compiler_params=pltpu.CompilerParams(
            dimension_semantics=("parallel",),
            vmem_limit_bytes=vmem_limit),
        cost_estimate=cost,
    )(xp, adj_bd, w1p, b1p, w2p, b2p)

    # Un-pad and assemble gh outside the kernel (free layout plumbing).
    h2 = h2_pad.reshape(B, N, Hp)[:, :, :H]
    gh = jnp.concatenate([gh1[:, :H], gh2[:, :H]], axis=-1)
    return h2, gh


def reference_forward(x, adj, w1, b1, w2, b2):
    h1 = jax.nn.relu(jnp.einsum("bij,bjh->bih", adj, x @ w1) + b1)
    h2 = jax.nn.relu(jnp.einsum("bij,bjh->bih", adj, h1 @ w2) + b2)
    gh = jnp.concatenate([jnp.sum(h1, axis=1), jnp.sum(h2, axis=1)], axis=-1)
    return h2, gh


if __name__ == "__main__":
    B, N, nfeat, nhid = 16, 8, 16, 32
    key = jax.random.PRNGKey(0)
    kx, ka, kw1, kb1, kw2, kb2 = jax.random.split(key, 6)

    x = jax.random.normal(kx, (B, N, nfeat), dtype=jnp.float32)

    # Symmetric, row-normalized adjacency with self-loops (typical GCN input).
    a_raw = (jax.random.uniform(ka, (B, N, N)) > 0.5).astype(jnp.float32)
    a_sym = jnp.maximum(a_raw, jnp.swapaxes(a_raw, 1, 2)) + jnp.eye(N)[None]
    adj = (a_sym / jnp.sum(a_sym, axis=-1, keepdims=True)).astype(jnp.float32)

    # Deterministic "uniform(-1/sqrt(out), 1/sqrt(out))" init (GCN reset_parameters).
    s = 1.0 / (nhid ** 0.5)
    w1 = jax.random.uniform(kw1, (nfeat, nhid), minval=-s, maxval=s, dtype=jnp.float32)
    b1 = jax.random.uniform(kb1, (1, nhid), minval=-s, maxval=s, dtype=jnp.float32)
    w2 = jax.random.uniform(kw2, (nhid, nhid), minval=-s, maxval=s, dtype=jnp.float32)
    b2 = jax.random.uniform(kb2, (1, nhid), minval=-s, maxval=s, dtype=jnp.float32)

    h2_expect, gh_expect = reference_forward(x, adj, w1, b1, w2, b2)

    # Exact-semantics CI gate: f32 matmul operands, tight tolerance.
    h2_f32, gh_f32 = encoder_forward(x, adj, w1, b1, w2, b2,
                                     matmul_dtype=jnp.float32)
    jax.block_until_ready((h2_f32, gh_f32))
    assert h2_f32.shape == (B, N, nhid) and gh_f32.shape == (B, 2 * nhid)
    assert jnp.allclose(h2_f32, h2_expect, atol=1e-4, rtol=1e-4)
    assert jnp.allclose(gh_f32, gh_expect, atol=1e-4, rtol=1e-4)

    # Fast path: bf16 MXU operands (f32 accumulation), bf16 h2 writeback.
    # Checked against an explicit relative-error budget instead of a loose atol.
    h2_bf, gh_bf = encoder_forward(x, adj, w1, b1, w2, b2,
                                   matmul_dtype=jnp.bfloat16,
                                   h2_dtype=jnp.bfloat16)
    jax.block_until_ready((h2_bf, gh_bf))
    assert h2_bf.shape == (B, N, nhid) and gh_bf.shape == (B, 2 * nhid)

    def rel_err(got, want):
        got = got.astype(jnp.float32)
        return float(jnp.max(jnp.abs(got - want)) / (jnp.max(jnp.abs(want)) + 1e-6))

    assert rel_err(h2_bf, h2_expect) < 2e-2, rel_err(h2_bf, h2_expect)
    assert rel_err(gh_bf, gh_expect) < 2e-2, rel_err(gh_bf, gh_expect)

    print("KERNEL_OK")
</pallas_src>

<mosaic_0001>
module attributes {stable_mosaic.version = 11 : i64} {
  func.func @encoder_kernel(%arg0: i32, %arg1: memref<128x16xf32, #tpu.memory_space<vmem>>, %arg2: memref<128x128xf32, #tpu.memory_space<vmem>>, %arg3: memref<16x128xf32, #tpu.memory_space<vmem>>, %arg4: memref<1x128xf32, #tpu.memory_space<vmem>>, %arg5: memref<128x128xf32, #tpu.memory_space<vmem>>, %arg6: memref<1x128xf32, #tpu.memory_space<vmem>>, %arg7: memref<128x128xf32, #tpu.memory_space<vmem>>, %arg8: memref<16x128xf32, #tpu.memory_space<vmem>>, %arg9: memref<16x128xf32, #tpu.memory_space<vmem>>) attributes {dimension_semantics = [#tpu.dimension_semantics<parallel>], iteration_bounds = array<i64: 1>, scalar_prefetch = 0 : i64, scratch_operands = 0 : i64, tpu.core_type = #tpu.core_type<tc>, window_params = [{transform_indices = @transform_0, window_bounds = array<i64: 128, 16>}, {transform_indices = @transform_1, window_bounds = array<i64: 128, 128>}, {pipeline_mode = #tpu.pipeline_mode<synchronous>, transform_indices = @transform_2, window_bounds = array<i64: 16, 128>}, {pipeline_mode = #tpu.pipeline_mode<synchronous>, transform_indices = @transform_3, window_bounds = array<i64: 1, 128>}, {pipeline_mode = #tpu.pipeline_mode<synchronous>, transform_indices = @transform_4, window_bounds = array<i64: 128, 128>}, {pipeline_mode = #tpu.pipeline_mode<synchronous>, transform_indices = @transform_5, window_bounds = array<i64: 1, 128>}, {transform_indices = @transform_6, window_bounds = array<i64: 128, 128>}, {transform_indices = @transform_7, window_bounds = array<i64: 16, 128>}, {transform_indices = @transform_8, window_bounds = array<i64: 16, 128>}]} {
    %c0 = arith.constant 0 : index
    %c0_0 = arith.constant 0 : index
    %0 = vector.load %arg1[%c0, %c0_0] : memref<128x16xf32, #tpu.memory_space<vmem>>, vector<128x16xf32>
    %c0_1 = arith.constant 0 : index
    %c0_2 = arith.constant 0 : index
    %1 = vector.load %arg2[%c0_1, %c0_2] : memref<128x128xf32, #tpu.memory_space<vmem>>, vector<128x128xf32>
    %c0_3 = arith.constant 0 : index
    %c0_4 = arith.constant 0 : index
    %2 = vector.load %arg3[%c0_3, %c0_4] : memref<16x128xf32, #tpu.memory_space<vmem>>, vector<16x128xf32>
    %c0_5 = arith.constant 0 : index
    %c0_6 = arith.constant 0 : index
    %3 = vector.load %arg5[%c0_5, %c0_6] : memref<128x128xf32, #tpu.memory_space<vmem>>, vector<128x128xf32>
    %c0_7 = arith.constant 0 : index
    %c0_8 = arith.constant 0 : index
    %4 = vector.load %arg4[%c0_7, %c0_8] : memref<1x128xf32, #tpu.memory_space<vmem>>, vector<1x128xf32>
    %c0_9 = arith.constant 0 : index
    %c0_10 = arith.constant 0 : index
    %5 = vector.load %arg6[%c0_9, %c0_10] : memref<1x128xf32, #tpu.memory_space<vmem>>, vector<1x128xf32>
    %cst = arith.constant dense<0.000000e+00> : vector<128x128xf32>
    %6 = tpu.matmul %0, %2, %cst {dimension_numbers = #tpu.dot_dimension_numbers<[1], [0], [0], [1], [0, 0, 1, 1], [], []>} : vector<128x16xf32>, vector<16x128xf32>, vector<128x128xf32> -> vector<128x128xf32>
    %cst_11 = arith.constant dense<0.000000e+00> : vector<128x128xf32>
    %7 = tpu.matmul %1, %6, %cst_11 {dimension_numbers = #tpu.dot_dimension_numbers<[1], [0], [0], [1], [0, 0, 1, 1], [], []>} : vector<128x128xf32>, vector<128x128xf32>, vector<128x128xf32> -> vector<128x128xf32>
    %8 = vector.broadcast %4 : vector<1x128xf32> to vector<128x128xf32>
    %9 = arith.addf %7, %8 : vector<128x128xf32>
    %cst_12 = arith.constant 0.000000e+00 : f32
    %10 = vector.broadcast %cst_12 : f32 to vector<128x128xf32>
    %11 = arith.maximumf %9, %10 : vector<128x128xf32>
    %cst_13 = arith.constant dense<0.000000e+00> : vector<128x128xf32>
    %12 = tpu.matmul %11, %3, %cst_13 {dimension_numbers = #tpu.dot_dimension_numbers<[1], [0], [0], [1], [0, 0, 1, 1], [], []>} : vector<128x128xf32>, vector<128x128xf32>, vector<128x128xf32> -> vector<128x128xf32>
    %cst_14 = arith.constant dense<0.000000e+00> : vector<128x128xf32>
    %13 = tpu.matmul %1, %12, %cst_14 {dimension_numbers = #tpu.dot_dimension_numbers<[1], [0], [0], [1], [0, 0, 1, 1], [], []>} : vector<128x128xf32>, vector<128x128xf32>, vector<128x128xf32> -> vector<128x128xf32>
    %14 = vector.broadcast %5 : vector<1x128xf32> to vector<128x128xf32>
    %15 = arith.addf %13, %14 : vector<128x128xf32>
    %cst_15 = arith.constant 0.000000e+00 : f32
    %16 = vector.broadcast %cst_15 : f32 to vector<128x128xf32>
    %17 = arith.maximumf %15, %16 : vector<128x128xf32>
    %c0_16 = arith.constant 0 : index
    %c0_17 = arith.constant 0 : index
    %18 = vector.load %arg7[%c0_16, %c0_17] : memref<128x128xf32, #tpu.memory_space<vmem>>, vector<128x128xf32>
    tpu.vector_store %arg7[%c0_16, %c0_17], %17 {strides = array<i32>} : memref<128x128xf32, #tpu.memory_space<vmem>>, vector<128x128xf32>,
    %19 = vector.shape_cast %11 : vector<128x128xf32> to vector<16x8x128xf32>
    %cst_18 = arith.constant dense<0.000000e+00> : vector<16x128xf32>
    %20 = vector.multi_reduction <add>, %19, %cst_18 [1] : vector<16x8x128xf32> to vector<16x128xf32>
    %c0_19 = arith.constant 0 : index
    %c0_20 = arith.constant 0 : index
    %21 = vector.load %arg8[%c0_19, %c0_20] : memref<16x128xf32, #tpu.memory_space<vmem>>, vector<16x128xf32>
    tpu.vector_store %arg8[%c0_19, %c0_20], %20 {strides = array<i32>} : memref<16x128xf32, #tpu.memory_space<vmem>>, vector<16x128xf32>,
    %22 = vector.shape_cast %17 : vector<128x128xf32> to vector<16x8x128xf32>
    %cst_21 = arith.constant dense<0.000000e+00> : vector<16x128xf32>
    %23 = vector.multi_reduction <add>, %22, %cst_21 [1] : vector<16x8x128xf32> to vector<16x128xf32>
    %c0_22 = arith.constant 0 : index
    %c0_23 = arith.constant 0 : index
    %24 = vector.load %arg9[%c0_22, %c0_23] : memref<16x128xf32, #tpu.memory_space<vmem>>, vector<16x128xf32>
    tpu.vector_store %arg9[%c0_22, %c0_23], %23 {strides = array<i32>} : memref<16x128xf32, #tpu.memory_space<vmem>>, vector<16x128xf32>,
    return
  }
  func.func @transform_0(%arg0: i32) -> (i32, i32) {
    %c0_i32 = arith.constant 0 : i32
    %c0_i32_0 = arith.constant 0 : i32
    return %arg0, %c0_i32 : i32, i32
  }
  func.func @transform_1(%arg0: i32) -> (i32, i32) {
    %c0_i32 = arith.constant 0 : i32
    %c0_i32_0 = arith.constant 0 : i32
    return %arg0, %c0_i32 : i32, i32
  }
  func.func @transform_2(%arg0: i32) -> (i32, i32) {
    %c0_i32 = arith.constant 0 : i32
    %c0_i32_0 = arith.constant 0 : i32
    %c0_i32_1 = arith.constant 0 : i32
    return %c0_i32, %c0_i32_0 : i32, i32
  }
  func.func @transform_3(%arg0: i32) -> (i32, i32) {
    %c0_i32 = arith.constant 0 : i32
    %c0_i32_0 = arith.constant 0 : i32
    %c0_i32_1 = arith.constant 0 : i32
    return %c0_i32, %c0_i32_0 : i32, i32
  }
  func.func @transform_4(%arg0: i32) -> (i32, i32) {
    %c0_i32 = arith.constant 0 : i32
    %c0_i32_0 = arith.constant 0 : i32
    %c0_i32_1 = arith.constant 0 : i32
    return %c0_i32, %c0_i32_0 : i32, i32
  }
  func.func @transform_5(%arg0: i32) -> (i32, i32) {
    %c0_i32 = arith.constant 0 : i32
    %c0_i32_0 = arith.constant 0 : i32
    %c0_i32_1 = arith.constant 0 : i32
    return %c0_i32, %c0_i32_0 : i32, i32
  }
  func.func @transform_6(%arg0: i32) -> (i32, i32) {
    %c0_i32 = arith.constant 0 : i32
    %c0_i32_0 = arith.constant 0 : i32
    return %arg0, %c0_i32 : i32, i32
  }
  func.func @transform_7(%arg0: i32) -> (i32, i32) {
    %c0_i32 = arith.constant 0 : i32
    %c0_i32_0 = arith.constant 0 : i32
    return %arg0, %c0_i32 : i32, i32
  }
  func.func @transform_8(%arg0: i32) -> (i32, i32) {
    %c0_i32 = arith.constant 0 : i32
    %c0_i32_0 = arith.constant 0 : i32
    return %arg0, %c0_i32 : i32, i32
  }
}

</mosaic_0001>

<bundles_post_ra>
// kernel: tpu_custom_call.1
= control target key start
LH: loop header
LB: loop body
LE: loop exit
PB: predicated region body
PF: predicated region fallthrough
CT: control target
= control target key end

     0   :  { %14 = vsyncpa [#allocation3], 0  ;;  %s1233_s0 = inlined_call_operand.vmem [shape: f32[128,16], index: 0, kind: input, shape index: {}]   ;;  %s1234_s1 = inlined_call_operand.vmem [shape: f32[128,128], index: 1, kind: input, shape index: {}]   ;;  %s1235_s2 = inlined_call_operand.vmem [shape: f32[16,128], index: 2, kind: input, shape index: {}]   ;;  %s1236_s3 = inlined_call_operand.vmem [shape: f32[1,128], index: 3, kind: input, shape index: {}]   ;;  %s1237_s4 = inlined_call_operand.hbm [shape: f32[128,128], index: 4, kind: input, shape index: {}]   ;;  %s1238_s5 = inlined_call_operand.vmem [shape: f32[1,128], index: 5, kind: input, shape index: {}]   ;;  %s1239_s6 = inlined_call_operand.hbm [shape: f32[128,128], index: 6, kind: output, shape index: {0}]   ;;  %s1240_s7 = inlined_call_operand.hbm [shape: f32[16,128], index: 7, kind: output, shape index: {1}]   ;;  %s1241_s8 = inlined_call_operand.hbm [shape: f32[16,128], index: 8, kind: output, shape index: {2}]  }
   0x1   :  { %15 = vsyncpa [#allocation4], 0 }
   0x2   :  { %16 = vsyncpa [#allocation7], 0  ;;  %s29_s29 = sshll.u32 %s1237_s4, 4  ;;  %s906_s30 = smov [#allocation2]   ;;  %s30_s29 = int_to_ptr.hbm [resolvable:$true] %s29_s29 }
   0x3   :  { %s31_s9 = sshll.u32 %s906_s30, 4  ;;  %s907_s10 = smov 128   ;;  %s32_s9 = int_to_ptr.vmem [resolvable:$true] %s31_s9 }
   0x4   :  { %s908_s11 = smov 8  }
   0x5   :  { %37 = dma.hbm_to_vmem [thread:$0]  %s30_s29, 2048, %s32_s9, [#allocation3], %s907_s10, %s907_s10, %s908_s11  }
   0x6   :  { %900 = dma.done.wait [#allocation3], 2048  }
   0x7   :  { %901 = vsyncadd [#allocation3], 4294965248  ;;  %v77_v0 = vld [vmem:[%s1235_s2 + $0x8] sm:$0xff]  ;;  %v76_v1 = vld [vmem:[%s1235_s2] sm:$0xff]  ;;  %vm96_vm0 = vcmask 130048   ;;  %vm571_vm1 = vcmask 1041409  }
   0x8   :  { %159 = vmatpush.msra.mxu0 %v77_v0  ;;  %v44_v2 = vld [vmem:[%s1233_s0] sm:$0xff]  ;;  %v45_v3 = vld [vmem:[%s1233_s0 + $0x8] sm:$0xff]  ;;  %v46_v4 = vld [vmem:[%s1233_s0 + $0x10] sm:$0xff]  ;;  %vm573_vm2 = vcmask 1042434   ;;  %vm575_vm3 = vcmask 1043459   ;;  %vm577_vm4 = vcmask 1044484  }
   0x9   :  { %v47_v5 = vld [vmem:[%s1233_s0 + $0x18] sm:$0xff]  ;;  %v48_v6 = vld [vmem:[%s1233_s0 + $0x20] sm:$0xff]  ;;  %v49_v7 = vld [vmem:[%s1233_s0 + $0x28] sm:$0xff]  ;;  %vm579_vm5 = vcmask 1045509   ;;  %vm581_vm6 = vcmask 1046534   ;;  %vm583_vm7 = vcmask 1047559  }
   0xa   :  { %160 = vmatpush.msra.mxu0 %v76_v1  ;;  %v50_v8 = vld [vmem:[%s1233_s0 + $0x30] sm:$0xff]  ;;  %v51_v9 = vld [vmem:[%s1233_s0 + $0x38] sm:$0xff]  ;;  %v52_v10 = vld [vmem:[%s1233_s0 + $0x40] sm:$0xff]  ;;  %s745_s4 = sshll.u32 %s1240_s7, 4  ;;  %s909_s16 = smov [#allocation6]   ;;  %s746_s4 = int_to_ptr.hbm [resolvable:$true] %s745_s4 }
   0xb   :  { %780 = vmatmul.msk.f32.vlgmr.msra.gmra.mxu0 %vm96_vm0, %v44_v2  ;;  %v53_v11 = vld [vmem:[%s1233_s0 + $0x48] sm:$0xff]  ;;  %v54_v12 = vld [vmem:[%s1233_s0 + $0x50] sm:$0xff]  ;;  %v55_v13 = vld [vmem:[%s1233_s0 + $0x58] sm:$0xff]  ;;  %s743_s17 = sshll.u32 %s909_s16, 4  ;;  %s732_s20 = sshll.u32 %s1239_s6, 4  ;;  %s744_s17 = int_to_ptr.vmem [resolvable:$true] %s743_s17  ;;  %s733_s20 = int_to_ptr.hbm [resolvable:$true] %s732_s20 }
   0xc   :  { %v56_v14 = vld [vmem:[%s1233_s0 + $0x60] sm:$0xff]  ;;  %v57_v15 = vld [vmem:[%s1233_s0 + $0x68] sm:$0xff]  ;;  %v58_v16 = vld [vmem:[%s1233_s0 + $0x70] sm:$0xff]  ;;  %s911_s6 = smov [#allocation8]   ;;  %s758_s23 = sshll.u32 %s1241_s8, 4  ;;  %s759_s23 = int_to_ptr.hbm [resolvable:$true] %s758_s23 }
   0xd   :  { %v59_v17 = vld [vmem:[%s1233_s0 + $0x78] sm:$0xff]  ;;  %v1036_v34 = vld [vmem:[%s1234_s1] sm:$0xff]  ;;  %v1042_v35 = vld [vmem:[%s1234_s1 + $0x8] sm:$0xff]  ;;  %s756_s2 = sshll.u32 %s911_s6, 4  ;;  %s757_s2 = int_to_ptr.vmem [resolvable:$true] %s756_s2 }
   0xe   :  { %v1048_v36 = vld [vmem:[%s1234_s1 + $0x10] sm:$0xff]  ;;  %v1054_v37 = vld [vmem:[%s1234_s1 + $0x18] sm:$0xff]  ;;  %v1060_v38 = vld [vmem:[%s1234_s1 + $0x20] sm:$0xff] }
   0xf   :  { %v1066_v39 = vld [vmem:[%s1234_s1 + $0x28] sm:$0xff]  ;;  %v1072_v40 = vld [vmem:[%s1234_s1 + $0x30] sm:$0xff]  ;;  %v1078_v41 = vld [vmem:[%s1234_s1 + $0x38] sm:$0xff] }
  0x10   :  { %v1084_v42 = vld [vmem:[%s1234_s1 + $0x40] sm:$0xff]  ;;  %v93_v43 = vld [vmem:[#allocation2 + $0x78] sm:$0xff]  ;;  %v92_v44 = vld [vmem:[#allocation2 + $0x70] sm:$0xff] }
  0x11   :  { %294 = vmatpush.msra.mxu2 %v93_v43  ;;  %v91_v45 = vld [vmem:[#allocation2 + $0x68] sm:$0xff]  ;;  %v90_v47 = vld [vmem:[#allocation2 + $0x60] sm:$0xff]  ;;  %v89_v48 = vld [vmem:[#allocation2 + $0x58] sm:$0xff] }
  0x12   :  { %v1090_v46 = vld [vmem:[%s1234_s1 + $0x48] sm:$0xff]  ;;  %v88_v49 = vld [vmem:[#allocation2 + $0x50] sm:$0xff]  ;;  %v86_v52 = vld [vmem:[#allocation2 + $0x40] sm:$0xff] }
  0x13   :  { %781 = vmatmul.msk.f32.gmra.mxu0 %vm96_vm0, %v45_v3  ;;  %295 = vmatpush.msra.mxu2 %v92_v44  ;;  %v87_v50 = vld [vmem:[#allocation2 + $0x48] sm:$0xff]  ;;  %v1096_v51 = vld [vmem:[%s1234_s1 + $0x50] sm:$0xff]  ;;  %v85_v53 = vld [vmem:[#allocation2 + $0x38] sm:$0xff] }
  0x14   :  { %v84_v54 = vld [vmem:[#allocation2 + $0x30] sm:$0xff]  ;;  %v83_v55 = vld [vmem:[#allocation2 + $0x28] sm:$0xff]  ;;  %v1102_v56 = vld [vmem:[%s1234_s1 + $0x58] sm:$0xff] }
  0x15   :  { %296 = vmatpush.msra.mxu2 %v91_v45  ;;  %v82_v57 = vld [vmem:[#allocation2 + $0x20] sm:$0xff]  ;;  %v81_v58 = vld [vmem:[#allocation2 + $0x18] sm:$0xff]  ;;  %v80_v59 = vld [vmem:[#allocation2 + $0x10] sm:$0xff] }
  0x16   :  { %v1108_v60 = vld [vmem:[%s1234_s1 + $0x60] sm:$0xff]  ;;  %v79_v61 = vld [vmem:[#allocation2 + $0x8] sm:$0xff]  ;;  %v1120_v0 = vld [vmem:[%s1234_s1 + $0x70] sm:$0xff] }
  0x17   :  { %297 = vmatpush.msra.mxu2 %v90_v47  ;;  %v78_v62 = vld [vmem:[#allocation2] sm:$0xff]  ;;  %v1114_v63 = vld [vmem:[%s1234_s1 + $0x68] sm:$0xff]  ;;  %v1126_v1 = vld [vmem:[%s1234_s1 + $0x78] sm:$0xff] }
  0x18   :  { %v1132_v2 = vld [vmem:[%s1236_s3] ss:$0 sm:$0xff] }
  0x19   :  { %298 = vmatpush.msra.mxu2 %v89_v48 }
  0x1b   :  { %782 = vmatmul.msk.f32.gmra.mxu0 %vm96_vm0, %v46_v4  ;;  %299 = vmatpush.msra.mxu2 %v88_v49 }
  0x1d   :  { %300 = vmatpush.msra.mxu2 %v87_v50 }
  0x1f   :  { %301 = vmatpush.msra.mxu2 %v86_v52 }
  0x21   :  { %302 = vmatpush.msra.mxu2 %v85_v53 }
  0x23   :  { %783 = vmatmul.msk.f32.gmra.mxu0 %vm96_vm0, %v47_v5  ;;  %303 = vmatpush.msra.mxu2 %v84_v54 }
  0x25   :  { %304 = vmatpush.msra.mxu2 %v83_v55 }
  0x27   :  { %305 = vmatpush.msra.mxu2 %v82_v57 }
  0x29   :  { %306 = vmatpush.msra.mxu2 %v81_v58 }
  0x2b   :  { %784 = vmatmul.msk.f32.gmra.mxu0 %vm96_vm0, %v48_v6  ;;  %307 = vmatpush.msra.mxu2 %v80_v59 }
  0x2d   :  { %308 = vmatpush.msra.mxu2 %v79_v61 }
  0x2f   :  { %309 = vmatpush.msra.mxu2 %v78_v62 }
  0x33   :  { %785 = vmatmul.msk.f32.gmra.mxu0 %vm96_vm0, %v49_v7 }
  0x3b   :  { %786 = vmatmul.msk.f32.gmra.mxu0 %vm96_vm0, %v50_v8 }
  0x43   :  { %787 = vmatmul.msk.f32.gmra.mxu0 %vm96_vm0, %v51_v9 }
  0x4b   :  { %788 = vmatmul.msk.f32.gmra.mxu0 %vm96_vm0, %v52_v10 }
  0x53   :  { %789 = vmatmul.msk.f32.gmra.mxu0 %vm96_vm0, %v53_v11 }
  0x5b   :  { %790 = vmatmul.msk.f32.gmra.mxu0 %vm96_vm0, %v54_v12 }
  0x63   :  { %791 = vmatmul.msk.f32.gmra.mxu0 %vm96_vm0, %v55_v13 }
  0x6b   :  { %792 = vmatmul.msk.f32.gmra.mxu0 %vm96_vm0, %v56_v14 }
  0x73   :  { %793 = vmatmul.msk.f32.gmra.mxu0 %vm96_vm0, %v57_v15 }
  0x7b   :  { %794 = vmatmul.msk.f32.gmra.mxu0 %vm96_vm0, %v58_v16 }
  0x83   :  { %795 = vmatmul.msk.f32.gmra.mxu0 %vm96_vm0, %v59_v17 }
  0x88   :  { %v162_v18 = vpop.f32.mrf.mxu0 }
  0x90   :  { %v165_v19 = vpop.f32.mrf.mxu0 }
  0x98   :  { %v168_v20 = vpop.f32.mrf.mxu0 }
  0xa0   :  { %v171_v21 = vpop.f32.mrf.mxu0 }
  0xa8   :  { %v174_v22 = vpop.f32.mrf.mxu0 }
  0xb0   :  { %v177_v23 = vpop.f32.mrf.mxu0 }
  0xb8   :  { %v180_v24 = vpop.f32.mrf.mxu0 }
  0xc0   :  { %v183_v25 = vpop.f32.mrf.mxu0 }
  0xc8   :  { %v186_v26 = vpop.f32.mrf.mxu0 }
  0xd0   :  { %v189_v27 = vpop.f32.mrf.mxu0 }
  0xd8   :  { %v192_v28 = vpop.f32.mrf.mxu0 }
  0xe0   :  { %v195_v29 = vpop.f32.mrf.mxu0 }
  0xe8   :  { %v198_v30 = vpop.f32.mrf.mxu0 }
  0xf0   :  { %v201_v31 = vpop.f32.mrf.mxu0 }
  0xf8   :  { %v204_v32 = vpop.f32.mrf.mxu0 }
 0x100   :  { %v207_v33 = vpop.f32.mrf.mxu0 }
 0x101   :  { %213 = vmatpush.msra.mxu1 %v207_v33 }
 0x103   :  { %214 = vmatpush.msra.mxu1 %v204_v32 }
 0x105   :  { %215 = vmatpush.msra.mxu1 %v201_v31 }
 0x107   :  { %216 = vmatpush.msra.mxu1 %v198_v30 }
 0x109   :  { %217 = vmatpush.msra.mxu1 %v195_v29 }
 0x10b   :  { %218 = vmatpush.msra.mxu1 %v192_v28 }
 0x10d   :  { %219 = vmatpush.msra.mxu1 %v189_v27 }
 0x10f   :  { %220 = vmatpush.msra.mxu1 %v186_v26 }
 0x111   :  { %221 = vmatpush.msra.mxu1 %v183_v25 }
 0x113   :  { %222 = vmatpush.msra.mxu1 %v180_v24 }
 0x115   :  { %223 = vmatpush.msra.mxu1 %v177_v23 }
 0x117   :  { %224 = vmatpush.msra.mxu1 %v174_v22 }
 0x119   :  { %225 = vmatpush.msra.mxu1 %v171_v21 }
 0x11b   :  { %226 = vmatpush.msra.mxu1 %v168_v20 }
 0x11d   :  { %227 = vmatpush.msra.mxu1 %v165_v19 }
 0x11f   :  { %228 = vmatpush.msra.mxu1 %v162_v18 }
 0x120   :  { %229 = vmatmul.f32.vlgmr.msra.gmra.mxu1 %v1036_v34 }
 0x128   :  { %232 = vmatmul.f32.gmra.mxu1 %v1042_v35 }
 0x130   :  { %235 = vmatmul.f32.gmra.mxu1 %v1048_v36 }
 0x138   :  { %238 = vmatmul.f32.gmra.mxu1 %v1054_v37 }
 0x140   :  { %241 = vmatmul.f32.gmra.mxu1 %v1060_v38 }
 0x148   :  { %244 = vmatmul.f32.gmra.mxu1 %v1066_v39 }
 0x150   :  { %247 = vmatmul.f32.gmra.mxu1 %v1072_v40 }
 0x158   :  { %250 = vmatmul.f32.gmra.mxu1 %v1078_v41 }
 0x160   :  { %253 = vmatmul.f32.gmra.mxu1 %v1084_v42 }
 0x168   :  { %256 = vmatmul.f32.gmra.mxu1 %v1090_v46 }
 0x170   :  { %259 = vmatmul.f32.gmra.mxu1 %v1096_v51 }
 0x178   :  { %262 = vmatmul.f32.gmra.mxu1 %v1102_v56 }
 0x180   :  { %265 = vmatmul.f32.gmra.mxu1 %v1108_v60 }
 0x188   :  { %268 = vmatmul.f32.gmra.mxu1 %v1114_v63 }
 0x190   :  { %271 = vmatmul.f32.gmra.mxu1 %v1120_v0 }
 0x198   :  { %274 = vmatmul.f32.gmra.mxu1 %v1126_v1 }
 0x19d   :  { %v230_v3 = vpop.f32.mrf.mxu1 }
 0x19e   :  { %v231_v4 = vadd.f32 %v1132_v2, %v230_v3 }
 0x1a0   :  { %v278_v5 = vmax.f32 %v231_v4, 0.0 }
 0x1a2   :  { %310 = vmatmul.f32.vlgmr.msra.gmra.mxu2 %v278_v5  ;;  %v459_v23 = vrot.slane %v278_v5, 4 }
 0x1a4   :  { %v460_v30 = vadd.f32 %v459_v23, %v278_v5 }
 0x1a5   :  { %v233_v6 = vpop.f32.mrf.mxu1 }
 0x1a6   :  { %v234_v7 = vadd.f32 %v1132_v2, %v233_v6  ;;  %v461_v48 = vrot.slane %v460_v30, 2 }
 0x1a8   :  { %v279_v8 = vmax.f32 %v234_v7, 0.0  ;;  %v462_v59 = vadd.f32 %v461_v48, %v460_v30 }
 0x1aa   :  { %313 = vmatmul.f32.gmra.mxu2 %v279_v8  ;;  %v465_v20 = vrot.slane %v279_v8, 4 }
 0x1ac   :  { %v466_v26 = vadd.f32 %v465_v20, %v279_v8 }
 0x1ad   :  { %v236_v9 = vpop.f32.mrf.mxu1 }
 0x1ae   :  { %v237_v10 = vadd.f32 %v1132_v2, %v236_v9  ;;  %v467_v43 = vrot.slane %v466_v26, 2 }
 0x1b0   :  { %v280_v11 = vmax.f32 %v237_v10, 0.0  ;;  %v468_v53 = vadd.f32 %v467_v43, %v466_v26  ;;  %v463_v10 = vrot.slane %v462_v59, 1 }
 0x1b2   :  { %316 = vmatmul.f32.gmra.mxu2 %v280_v11  ;;  %v471_v22 = vrot.slane %v280_v11, 4  ;;  %v469_v5 = vrot.slane %v468_v53, 1  ;;  %v464_v20 = vadd.f32 %v463_v10, %v462_v59 }
 0x1b4   :  { %v472_v28 = vadd.f32 %v471_v22, %v280_v11 }
 0x1b5   :  { %v239_v12 = vpop.f32.mrf.mxu1 }
 0x1b6   :  { %v240_v13 = vadd.f32 %v1132_v2, %v239_v12  ;;  %v473_v47 = vrot.slane %v472_v28, 2 }
 0x1b8   :  { %v281_v14 = vmax.f32 %v240_v13, 0.0  ;;  %v474_v57 = vadd.f32 %v473_v47, %v472_v28 }
 0x1ba   :  { %319 = vmatmul.f32.gmra.mxu2 %v281_v14  ;;  %v477_v24 = vrot.slane %v281_v14, 4  ;;  %v475_v8 = vrot.slane %v474_v57, 1 }
 0x1bc   :  { %v478_v31 = vadd.f32 %v477_v24, %v281_v14  ;;  %v470_v14 = vadd.f32 %v469_v5, %v468_v53 }
 0x1bd   :  { %v242_v15 = vpop.f32.mrf.mxu1 }
 0x1be   :  { %v243_v16 = vadd.f32 %v1132_v2, %v242_v15  ;;  %v479_v49 = vrot.slane %v478_v31, 2 }
 0x1c0   :  { %v282_v17 = vmax.f32 %v243_v16, 0.0  ;;  %v480_v61 = vadd.f32 %v479_v49, %v478_v31 }
 0x1c2   :  { %322 = vmatmul.f32.gmra.mxu2 %v282_v17  ;;  %v483_v25 = vrot.slane %v282_v17, 4  ;;  %v481_v11 = vrot.slane %v480_v61, 1 }
 0x1c4   :  { %v484_v33 = vadd.f32 %v483_v25, %v282_v17  ;;  %v476_v17 = vadd.f32 %v475_v8, %v474_v57  ;;  %v572_v25 = vsel %vm571_vm1, %v470_v14, %v464_v20 }
 0x1c5   :  { %v245_v18 = vpop.f32.mrf.mxu1 }
 0x1c6   :  { %v246_v19 = vadd.f32 %v1132_v2, %v245_v18  ;;  %v485_v52 = vrot.slane %v484_v33, 2 }
 0x1c8   :  { %v283_v21 = vmax.f32 %v246_v19, 0.0  ;;  %v486_v4 = vadd.f32 %v485_v52, %v484_v33 }
 0x1ca   :  { %325 = vmatmul.f32.gmra.mxu2 %v283_v21  ;;  %v489_v27 = vrot.slane %v283_v21, 4  ;;  %v487_v13 = vrot.slane %v486_v4, 1 }
 0x1cc   :  { %v490_v44 = vadd.f32 %v489_v27, %v283_v21  ;;  %v482_v21 = vadd.f32 %v481_v11, %v480_v61  ;;  %v488_v24 = vadd.f32 %v487_v13, %v486_v4 }
 0x1cd   :  { %v248_v29 = vpop.f32.mrf.mxu1 }
 0x1ce   :  { %v249_v32 = vadd.f32 %v1132_v2, %v248_v29  ;;  %v491_v54 = vrot.slane %v490_v44, 2  ;;  %v574_v29 = vsel %vm573_vm2, %v476_v17, %v572_v25 }
 0x1cf   :  { %v576_v31 = vsel %vm575_vm3, %v482_v21, %v574_v29 }
 0x1d0   :  { %v284_v45 = vmax.f32 %v249_v32, 0.0  ;;  %v492_v6 = vadd.f32 %v491_v54, %v490_v44  ;;  %v578_v33 = vsel %vm577_vm4, %v488_v24, %v576_v31 }
 0x1d2   :  { %v495_v50 = vrot.slane %v284_v45, 4  ;;  %328 = vmatmul.f32.gmra.mxu2 %v284_v45  ;;  %v493_v15 = vrot.slane %v492_v6, 1 }
 0x1d4   :  { %v496_v55 = vadd.f32 %v495_v50, %v284_v45  ;;  %v494_v26 = vadd.f32 %v493_v15, %v492_v6 }
 0x1d5   :  { %v251_v58 = vpop.f32.mrf.mxu1 }
 0x1d6   :  { %v497_v62 = vrot.slane %v496_v55, 2  ;;  %v252_v3 = vadd.f32 %v1132_v2, %v251_v58  ;;  %v580_v44 = vsel %vm579_vm5, %v494_v26, %v578_v33 }
 0x1d8   :  { %v285_v7 = vmax.f32 %v252_v3, 0.0  ;;  %v498_v9 = vadd.f32 %v497_v62, %v496_v55 }
 0x1da   :  { %v501_v12 = vrot.slane %v285_v7, 4  ;;  %331 = vmatmul.f32.gmra.mxu2 %v285_v7  ;;  %v499_v18 = vrot.slane %v498_v9, 1 }
 0x1dc   :  { %v502_v16 = vadd.f32 %v501_v12, %v285_v7  ;;  %v500_v30 = vadd.f32 %v499_v18, %v498_v9 }
 0x1dd   :  { %v254_v19 = vpop.f32.mrf.mxu1 }
 0x1de   :  { %v503_v22 = vrot.slane %v502_v16, 2  ;;  %v255_v23 = vadd.f32 %v1132_v2, %v254_v19  ;;  %v582_v47 = vsel %vm581_vm6, %v500_v30, %v580_v44 }
 0x1e0   :  { %v504_v27 = vadd.f32 %v503_v22, %v502_v16  ;;  %v286_v28 = vmax.f32 %v255_v23, 0.0 }
 0x1e2   :  { %v505_v32 = vrot.slane %v504_v27, 1  ;;  %334 = vmatmul.f32.gmra.mxu2 %v286_v28  ;;  %v507_v8 = vrot.slane %v286_v28, 4 }
 0x1e4   :  { %v506_v43 = vadd.f32 %v505_v32, %v504_v27  ;;  %v508_v15 = vadd.f32 %v507_v8, %v286_v28 }
 0x1e5   :  { %v257_v45 = vpop.f32.mrf.mxu1 }
 0x1e6   :  { %v258_v48 = vadd.f32 %v1132_v2, %v257_v45  ;;  %v584_v49 = vsel %vm583_vm7, %v506_v43, %v582_v47  ;;  %v509_v23 = vrot.slane %v508_v15, 2 }
 0x1e7   :  { %594 = vst [vmem:[#allocation6] sm:$0xff] %v584_v49 }
 0x1e8   :  { %v287_v50 = vmax.f32 %v258_v48, 0.0  ;;  %v510_v33 = vadd.f32 %v509_v23, %v508_v15 }
 0x1ea   :  { %337 = vmatmul.f32.gmra.mxu2 %v287_v50  ;;  %v513_v5 = vrot.slane %v287_v50, 4 }
 0x1ec   :  { %v514_v11 = vadd.f32 %v513_v5, %v287_v50 }
 0x1ed   :  { %v260_v52 = vpop.f32.mrf.mxu1 }
 0x1ee   :  { %v261_v53 = vadd.f32 %v1132_v2, %v260_v52  ;;  %v515_v19 = vrot.slane %v514_v11, 2 }
 0x1f0   :  { %v288_v54 = vmax.f32 %v261_v53, 0.0  ;;  %v516_v27 = vadd.f32 %v515_v19, %v514_v11  ;;  %v511_v53 = vrot.slane %v510_v33, 1 }
 0x1f2   :  { %340 = vmatmul.f32.gmra.mxu2 %v288_v54  ;;  %v519_v7 = vrot.slane %v288_v54, 4  ;;  %v517_v47 = vrot.slane %v516_v27, 1 }
 0x1f4   :  { %v520_v13 = vadd.f32 %v519_v7, %v288_v54 }
 0x1f5   :  { %v263_v55 = vpop.f32.mrf.mxu1 }
 0x1f6   :  { %v264_v57 = vadd.f32 %v1132_v2, %v263_v55  ;;  %v521_v22 = vrot.slane %v520_v13, 2 }
 0x1f8   :  { %v289_v58 = vmax.f32 %v264_v57, 0.0  ;;  %v522_v31 = vadd.f32 %v521_v22, %v520_v13 }
 0x1fa   :  { %343 = vmatmul.f32.gmra.mxu2 %v289_v58  ;;  %v525_v9 = vrot.slane %v289_v58, 4  ;;  %v523_v50 = vrot.slane %v522_v31, 1 }
 0x1fc   :  { %v526_v16 = vadd.f32 %v525_v9, %v289_v58  ;;  %v518_v58 = vadd.f32 %v517_v47, %v516_v27 }
 0x1fd   :  { %v266_v59 = vpop.f32.mrf.mxu1 }
 0x1fe   :  { %v267_v61 = vadd.f32 %v1132_v2, %v266_v59  ;;  %v527_v24 = vrot.slane %v526_v16, 2 }
 0x200   :  { %v290_v62 = vmax.f32 %v267_v61, 0.0  ;;  %v528_v28 = vadd.f32 %v527_v24, %v526_v16 }
 0x202   :  { %346 = vmatmul.f32.gmra.mxu2 %v290_v62  ;;  %v531_v10 = vrot.slane %v290_v62, 4  ;;  %v529_v54 = vrot.slane %v528_v28, 1 }
 0x204   :  { %v532_v18 = vadd.f32 %v531_v10, %v290_v62  ;;  %v524_v62 = vadd.f32 %v523_v50, %v522_v31  ;;  %v530_v5 = vadd.f32 %v529_v54, %v528_v28 }
 0x205   :  { %v269_v3 = vpop.f32.mrf.mxu1 }
 0x206   :  { %v270_v4 = vadd.f32 %v1132_v2, %v269_v3  ;;  %v533_v26 = vrot.slane %v532_v18, 2 }
 0x208   :  { %v291_v6 = vmax.f32 %v270_v4, 0.0  ;;  %v534_v45 = vadd.f32 %v533_v26, %v532_v18  ;;  %v512_v4 = vadd.f32 %v511_v53, %v510_v33 }
 0x20a   :  { %349 = vmatmul.f32.gmra.mxu2 %v291_v6  ;;  %v537_v12 = vrot.slane %v291_v6, 4  ;;  %v535_v57 = vrot.slane %v534_v45, 1  ;;  %v585_v7 = vsel %vm571_vm1, %v518_v58, %v512_v4 }
 0x20b   :  { %v586_v10 = vsel %vm573_vm2, %v524_v62, %v585_v7 }
 0x20c   :  { %v538_v20 = vadd.f32 %v537_v12, %v291_v6  ;;  %v587_v12 = vsel %vm575_vm3, %v530_v5, %v586_v10 }
 0x20d   :  { %v272_v14 = vpop.f32.mrf.mxu1 }
 0x20e   :  { %v273_v17 = vadd.f32 %v1132_v2, %v272_v14  ;;  %v539_v29 = vrot.slane %v538_v20, 2 }
 0x210   :  { %v292_v21 = vmax.f32 %v273_v17, 0.0  ;;  %v540_v48 = vadd.f32 %v539_v29, %v538_v20 }
 0x212   :  { %v543_v25 = vrot.slane %v292_v21, 4  ;;  %352 = vmatmul.f32.gmra.mxu2 %v292_v21  ;;  %v541_v59 = vrot.slane %v540_v48, 1 }
 0x214   :  { %v544_v30 = vadd.f32 %v543_v25, %v292_v21  ;;  %v542_v8 = vadd.f32 %v541_v59, %v540_v48 }
 0x215   :  { %v275_v32 = vpop.f32.mrf.mxu1 }
 0x216   :  { %v545_v43 = vrot.slane %v544_v30, 2  ;;  %v276_v44 = vadd.f32 %v1132_v2, %v275_v32  ;;  %v536_v2 = vadd.f32 %v535_v57, %v534_v45 }
 0x218   :  { %v293_v49 = vmax.f32 %v276_v44, 0.0  ;;  %v546_v52 = vadd.f32 %v545_v43, %v544_v30  ;;  %v588_v14 = vsel %vm577_vm4, %v536_v2, %v587_v12 }
 0x219   :  { %v589_v16 = vsel %vm579_vm5, %v542_v8, %v588_v14 }
 0x21a   :  { %v549_v55 = vrot.slane %v293_v49, 4  ;;  %355 = vmatmul.f32.gmra.mxu2 %v293_v49  ;;  %v547_v3 = vrot.slane %v546_v52, 1 }
 0x21c   :  { %v550_v61 = vadd.f32 %v549_v55, %v293_v49  ;;  %v548_v11 = vadd.f32 %v547_v3, %v546_v52 }
 0x21e   :  { %v551_v6 = vrot.slane %v550_v61, 2  ;;  %v590_v18 = vsel %vm581_vm6, %v548_v11, %v589_v16 }
 0x220   :  { %v552_v9 = vadd.f32 %v551_v6, %v550_v61 }
 0x222   :  { %v553_v13 = vrot.slane %v552_v9, 1 }
 0x224   :  { %v554_v15 = vadd.f32 %v553_v13, %v552_v9 }
 0x225   :  { %v311_v17 = vpop.f32.mrf.mxu2 }
 0x226   :  { %v591_v19 = vsel %vm583_vm7, %v554_v15, %v590_v18 }
 0x227   :  { %595 = vst [vmem:[#allocation6 + $0x8] sm:$0xff] %v591_v19 }
 0x228   :  { %751 = dma.vmem_to_hbm [thread:$0]  %s744_s17, 256, %s746_s4, [#allocation7], %s907_s10, %s907_s10, %s908_s11  }
 0x22d   :  { %v314_v20 = vpop.f32.mrf.mxu2 }
 0x235   :  { %v317_v21 = vpop.f32.mrf.mxu2 }
 0x23d   :  { %v320_v22 = vpop.f32.mrf.mxu2 }
 0x245   :  { %v323_v23 = vpop.f32.mrf.mxu2 }
 0x24d   :  { %v326_v24 = vpop.f32.mrf.mxu2 }
 0x255   :  { %v329_v25 = vpop.f32.mrf.mxu2 }
 0x25d   :  { %v332_v26 = vpop.f32.mrf.mxu2 }
 0x265   :  { %v335_v27 = vpop.f32.mrf.mxu2 }
 0x26d   :  { %v338_v29 = vpop.f32.mrf.mxu2 }
 0x275   :  { %v341_v30 = vpop.f32.mrf.mxu2 }
 0x27d   :  { %v344_v31 = vpop.f32.mrf.mxu2 }
 0x285   :  { %v347_v32 = vpop.f32.mrf.mxu2 }
 0x28d   :  { %v350_v33 = vpop.f32.mrf.mxu2 }
 0x295   :  { %v353_v28 = vpop.f32.mrf.mxu2 }
 0x29d   :  { %v356_v43 = vpop.f32.mrf.mxu2 }
 0x29e   :  { %362 = vmatpush.msra.mxu3 %v356_v43 }
 0x2a0   :  { %363 = vmatpush.msra.mxu3 %v353_v28 }
 0x2a2   :  { %364 = vmatpush.msra.mxu3 %v350_v33 }
 0x2a4   :  { %365 = vmatpush.msra.mxu3 %v347_v32 }
 0x2a6   :  { %366 = vmatpush.msra.mxu3 %v344_v31 }
 0x2a8   :  { %367 = vmatpush.msra.mxu3 %v341_v30 }
 0x2aa   :  { %368 = vmatpush.msra.mxu3 %v338_v29 }
 0x2ac   :  { %369 = vmatpush.msra.mxu3 %v335_v27 }
 0x2ae   :  { %370 = vmatpush.msra.mxu3 %v332_v26 }
 0x2b0   :  { %371 = vmatpush.msra.mxu3 %v329_v25 }
 0x2b2   :  { %372 = vmatpush.msra.mxu3 %v326_v24 }
 0x2b4   :  { %373 = vmatpush.msra.mxu3 %v323_v23 }
 0x2b6   :  { %374 = vmatpush.msra.mxu3 %v320_v22 }
 0x2b8   :  { %375 = vmatpush.msra.mxu3 %v317_v21 }
 0x2ba   :  { %376 = vmatpush.msra.mxu3 %v314_v20 }
 0x2bc   :  { %377 = vmatpush.msra.mxu3 %v311_v17 }
 0x2bd   :  { %378 = vmatmul.f32.vlgmr.msra.gmra.mxu3 %v1036_v34  ;;  %v1183_v34 = vld [vmem:[%s1238_s5] ss:$0 sm:$0xff]  ;;  %s910_s5 = smov [#allocation5]  }
 0x2be   :  { %s730_s7 = sshll.u32 %s910_s5, 4  ;;  %s731_s7 = int_to_ptr.vmem [resolvable:$true] %s730_s7 }
 0x2c5   :  { %381 = vmatmul.f32.gmra.mxu3 %v1042_v35 }
 0x2cd   :  { %384 = vmatmul.f32.gmra.mxu3 %v1048_v36 }
 0x2d5   :  { %387 = vmatmul.f32.gmra.mxu3 %v1054_v37 }
 0x2dd   :  { %390 = vmatmul.f32.gmra.mxu3 %v1060_v38 }
 0x2e5   :  { %393 = vmatmul.f32.gmra.mxu3 %v1066_v39 }
 0x2ed   :  { %396 = vmatmul.f32.gmra.mxu3 %v1072_v40 }
 0x2f5   :  { %399 = vmatmul.f32.gmra.mxu3 %v1078_v41 }
 0x2fd   :  { %402 = vmatmul.f32.gmra.mxu3 %v1084_v42 }
 0x305   :  { %405 = vmatmul.f32.gmra.mxu3 %v1090_v46 }
 0x30d   :  { %408 = vmatmul.f32.gmra.mxu3 %v1096_v51 }
 0x315   :  { %411 = vmatmul.f32.gmra.mxu3 %v1102_v56 }
 0x31d   :  { %414 = vmatmul.f32.gmra.mxu3 %v1108_v60 }
 0x325   :  { %417 = vmatmul.f32.gmra.mxu3 %v1114_v63 }
 0x32d   :  { %420 = vmatmul.f32.gmra.mxu3 %v1120_v0 }
 0x335   :  { %423 = vmatmul.f32.gmra.mxu3 %v1126_v1 }
 0x340   :  { %v379_v35 = vpop.f32.mrf.mxu3 }
 0x341   :  { %v380_v36 = vadd.f32 %v1183_v34, %v379_v35 }
 0x343   :  { %v427_v37 = vmax.f32 %v380_v36, 0.0 }
 0x345   :  { %443 = vst [vmem:[#allocation5] sm:$0xff] %v427_v37  ;;  %v596_v50 = vrot.slane %v427_v37, 4 }
 0x347   :  { %v597_v59 = vadd.f32 %v596_v50, %v427_v37 }
 0x348   :  { %v382_v38 = vpop.f32.mrf.mxu3 }
 0x349   :  { %v383_v39 = vadd.f32 %v1183_v34, %v382_v38  ;;  %v598_v7 = vrot.slane %v597_v59, 2 }
 0x34b   :  { %v428_v40 = vmax.f32 %v383_v39, 0.0  ;;  %v599_v16 = vadd.f32 %v598_v7, %v597_v59 }
 0x34d   :  { %444 = vst [vmem:[#allocation5 + $0x8] sm:$0xff] %v428_v40  ;;  %v602_v47 = vrot.slane %v428_v40, 4  ;;  %v600_v26 = vrot.slane %v599_v16, 1 }
 0x34f   :  { %v603_v54 = vadd.f32 %v602_v47, %v428_v40  ;;  %v601_v36 = vadd.f32 %v600_v26, %v599_v16 }
 0x350   :  { %v385_v41 = vpop.f32.mrf.mxu3 }
 0x351   :  { %v386_v42 = vadd.f32 %v1183_v34, %v385_v41  ;;  %v604_v4 = vrot.slane %v603_v54, 2 }
 0x353   :  { %v429_v46 = vmax.f32 %v386_v42, 0.0  ;;  %v605_v11 = vadd.f32 %v604_v4, %v603_v54 }
 0x355   :  { %445 = vst [vmem:[#allocation5 + $0x10] sm:$0xff] %v429_v46  ;;  %v608_v49 = vrot.slane %v429_v46, 4  ;;  %v606_v21 = vrot.slane %v605_v11, 1 }
 0x357   :  { %v609_v57 = vadd.f32 %v608_v49, %v429_v46  ;;  %v607_v31 = vadd.f32 %v606_v21, %v605_v11 }
 0x358   :  { %v388_v51 = vpop.f32.mrf.mxu3 }
 0x359   :  { %v389_v56 = vadd.f32 %v1183_v34, %v388_v51  ;;  %v610_v2 = vrot.slane %v609_v57, 2  ;;  %v708_v41 = vsel %vm571_vm1, %v607_v31, %v601_v36 }
 0x35b   :  { %v430_v60 = vmax.f32 %v389_v56, 0.0  ;;  %v611_v14 = vadd.f32 %v610_v2, %v609_v57 }
 0x35d   :  { %446 = vst [vmem:[#allocation5 + $0x18] sm:$0xff] %v430_v60  ;;  %v614_v52 = vrot.slane %v430_v60, 4  ;;  %v612_v24 = vrot.slane %v611_v14, 1 }
 0x35f   :  { %v615_v61 = vadd.f32 %v614_v52, %v430_v60  ;;  %v613_v28 = vadd.f32 %v612_v24, %v611_v14 }
 0x360   :  { %v391_v63 = vpop.f32.mrf.mxu3 }
 0x361   :  { %v392_v0 = vadd.f32 %v1183_v34, %v391_v63  ;;  %v616_v8 = vrot.slane %v615_v61, 2  ;;  %v709_v56 = vsel %vm573_vm2, %v613_v28, %v708_v41 }
 0x363   :  { %v431_v1 = vmax.f32 %v392_v0, 0.0  ;;  %v617_v17 = vadd.f32 %v616_v8, %v615_v61 }
 0x365   :  { %447 = vst [vmem:[#allocation5 + $0x20] sm:$0xff] %v431_v1  ;;  %v620_v53 = vrot.slane %v431_v1, 4  ;;  %v618_v27 = vrot.slane %v617_v17, 1 }
 0x367   :  { %v621_v3 = vadd.f32 %v620_v53, %v431_v1  ;;  %v619_v37 = vadd.f32 %v618_v27, %v617_v17 }
 0x368   :  { %v394_v44 = vpop.f32.mrf.mxu3 }
 0x369   :  { %v395_v45 = vadd.f32 %v1183_v34, %v394_v44  ;;  %v622_v10 = vrot.slane %v621_v3, 2  ;;  %v710_v63 = vsel %vm575_vm3, %v619_v37, %v709_v56 }
 0x36b   :  { %v432_v48 = vmax.f32 %v395_v45, 0.0  ;;  %v623_v20 = vadd.f32 %v622_v10, %v621_v3 }
 0x36d   :  { %448 = vst [vmem:[#allocation5 + $0x28] sm:$0xff] %v432_v48  ;;  %v626_v55 = vrot.slane %v432_v48, 4  ;;  %v624_v30 = vrot.slane %v623_v20, 1 }
 0x36f   :  { %v627_v5 = vadd.f32 %v626_v55, %v432_v48  ;;  %v625_v40 = vadd.f32 %v624_v30, %v623_v20 }
 0x370   :  { %v397_v58 = vpop.f32.mrf.mxu3 }
 0x371   :  { %v398_v62 = vadd.f32 %v1183_v34, %v397_v58  ;;  %v628_v12 = vrot.slane %v627_v5, 2  ;;  %v711_v1 = vsel %vm577_vm4, %v625_v40, %v710_v63 }
 0x373   :  { %v433_v6 = vmax.f32 %v398_v62, 0.0  ;;  %v629_v22 = vadd.f32 %v628_v12, %v627_v5 }
 0x375   :  { %449 = vst [vmem:[#allocation5 + $0x30] sm:$0xff] %v433_v6  ;;  %v632_v9 = vrot.slane %v433_v6, 4  ;;  %v630_v32 = vrot.slane %v629_v22, 1 }
 0x377   :  { %v633_v13 = vadd.f32 %v632_v9, %v433_v6  ;;  %v631_v42 = vadd.f32 %v630_v32, %v629_v22 }
 0x378   :  { %v400_v15 = vpop.f32.mrf.mxu3 }
 0x379   :  { %v634_v18 = vrot.slane %v633_v13, 2  ;;  %v401_v19 = vadd.f32 %v1183_v34, %v400_v15  ;;  %v712_v45 = vsel %vm579_vm5, %v631_v42, %v711_v1 }
 0x37b   :  { %v434_v23 = vmax.f32 %v401_v19, 0.0  ;;  %v635_v25 = vadd.f32 %v634_v18, %v633_v13 }
 0x37d   :  { %450 = vst [vmem:[#allocation5 + $0x38] sm:$0xff] %v434_v23  ;;  %v638_v29 = vrot.slane %v434_v23, 4  ;;  %v636_v43 = vrot.slane %v635_v25, 1 }
 0x37f   :  { %v639_v33 = vadd.f32 %v638_v29, %v434_v23  ;;  %v637_v60 = vadd.f32 %v636_v43, %v635_v25 }
 0x380   :  { %v403_v35 = vpop.f32.mrf.mxu3 }
 0x381   :  { %v640_v38 = vrot.slane %v639_v33, 2  ;;  %v404_v39 = vadd.f32 %v1183_v34, %v403_v35  ;;  %v713_v48 = vsel %vm581_vm6, %v637_v60, %v712_v45 }
 0x383   :  { %v641_v46 = vadd.f32 %v640_v38, %v639_v33  ;;  %v435_v51 = vmax.f32 %v404_v39, 0.0 }
 0x385   :  { %v642_v0 = vrot.slane %v641_v46, 1  ;;  %451 = vst [vmem:[#allocation5 + $0x40] sm:$0xff] %v435_v51  ;;  %v644_v8 = vrot.slane %v435_v51, 4 }
 0x387   :  { %v643_v44 = vadd.f32 %v642_v0, %v641_v46  ;;  %v645_v15 = vadd.f32 %v644_v8, %v435_v51 }
 0x388   :  { %v406_v47 = vpop.f32.mrf.mxu3 }
 0x389   :  { %v407_v49 = vadd.f32 %v1183_v34, %v406_v47  ;;  %v714_v50 = vsel %vm583_vm7, %v643_v44, %v713_v48  ;;  %v646_v23 = vrot.slane %v645_v15, 2 }
 0x38a   :  { %724 = vst [vmem:[#allocation8] sm:$0xff] %v714_v50 }
 0x38b   :  { %v436_v52 = vmax.f32 %v407_v49, 0.0  ;;  %v647_v33 = vadd.f32 %v646_v23, %v645_v15 }
 0x38d   :  { %452 = vst [vmem:[#allocation5 + $0x48] sm:$0xff] %v436_v52  ;;  %v650_v6 = vrot.slane %v436_v52, 4  ;;  %v648_v42 = vrot.slane %v647_v33, 1 }
 0x38f   :  { %v651_v11 = vadd.f32 %v650_v6, %v436_v52  ;;  %v649_v44 = vadd.f32 %v648_v42, %v647_v33 }
 0x390   :  { %v409_v53 = vpop.f32.mrf.mxu3 }
 0x391   :  { %v410_v54 = vadd.f32 %v1183_v34, %v409_v53  ;;  %v652_v19 = vrot.slane %v651_v11, 2 }
 0x393   :  { %v437_v55 = vmax.f32 %v410_v54, 0.0  ;;  %v653_v27 = vadd.f32 %v652_v19, %v651_v11 }
 0x395   :  { %453 = vst [vmem:[#allocation5 + $0x50] sm:$0xff] %v437_v55  ;;  %v656_v7 = vrot.slane %v437_v55, 4  ;;  %v654_v37 = vrot.slane %v653_v27, 1 }
 0x397   :  { %v657_v13 = vadd.f32 %v656_v7, %v437_v55  ;;  %v655_v60 = vadd.f32 %v654_v37, %v653_v27 }
 0x398   :  { %v412_v57 = vpop.f32.mrf.mxu3 }
 0x399   :  { %v413_v58 = vadd.f32 %v1183_v34, %v412_v57  ;;  %v658_v22 = vrot.slane %v657_v13, 2  ;;  %v715_v49 = vsel %vm571_vm1, %v655_v60, %v649_v44 }
 0x39b   :  { %v438_v59 = vmax.f32 %v413_v58, 0.0  ;;  %v659_v31 = vadd.f32 %v658_v22, %v657_v13 }
 0x39d   :  { %454 = vst [vmem:[#allocation5 + $0x58] sm:$0xff] %v438_v59  ;;  %v662_v9 = vrot.slane %v438_v59, 4  ;;  %v660_v40 = vrot.slane %v659_v31, 1 }
 0x39f   :  { %v663_v16 = vadd.f32 %v662_v9, %v438_v59  ;;  %v661_v0 = vadd.f32 %v660_v40, %v659_v31 }
 0x3a0   :  { %v415_v61 = vpop.f32.mrf.mxu3 }
 0x3a1   :  { %v416_v62 = vadd.f32 %v1183_v34, %v415_v61  ;;  %v664_v24 = vrot.slane %v663_v16, 2  ;;  %v716_v53 = vsel %vm573_vm2, %v661_v0, %v715_v49 }
 0x3a3   :  { %v439_v3 = vmax.f32 %v416_v62, 0.0  ;;  %v665_v28 = vadd.f32 %v664_v24, %v663_v16 }
 0x3a5   :  { %455 = vst [vmem:[#allocation5 + $0x60] sm:$0xff] %v439_v3  ;;  %v668_v10 = vrot.slane %v439_v3, 4  ;;  %v666_v46 = vrot.slane %v665_v28, 1 }
 0x3a7   :  { %v669_v18 = vadd.f32 %v668_v10, %v439_v3  ;;  %v667_v45 = vadd.f32 %v666_v46, %v665_v28 }
 0x3a8   :  { %v418_v4 = vpop.f32.mrf.mxu3 }
 0x3a9   :  { %v419_v5 = vadd.f32 %v1183_v34, %v418_v4  ;;  %v670_v26 = vrot.slane %v669_v18, 2  ;;  %v717_v55 = vsel %vm575_vm3, %v667_v45, %v716_v53 }
 0x3ab   :  { %v440_v2 = vmax.f32 %v419_v5, 0.0  ;;  %v671_v36 = vadd.f32 %v670_v26, %v669_v18 }
 0x3ad   :  { %456 = vst [vmem:[#allocation5 + $0x68] sm:$0xff] %v440_v2  ;;  %v674_v12 = vrot.slane %v440_v2, 4  ;;  %v672_v56 = vrot.slane %v671_v36, 1 }
 0x3af   :  { %v675_v20 = vadd.f32 %v674_v12, %v440_v2  ;;  %v673_v48 = vadd.f32 %v672_v56, %v671_v36 }
 0x3b0   :  { %v421_v14 = vpop.f32.mrf.mxu3 }
 0x3b1   :  { %v422_v17 = vadd.f32 %v1183_v34, %v421_v14  ;;  %v676_v29 = vrot.slane %v675_v20, 2  ;;  %v718_v58 = vsel %vm577_vm4, %v673_v48, %v717_v55 }
 0x3b3   :  { %v441_v21 = vmax.f32 %v422_v17, 0.0  ;;  %v677_v38 = vadd.f32 %v676_v29, %v675_v20 }
 0x3b5   :  { %457 = vst [vmem:[#allocation5 + $0x70] sm:$0xff] %v441_v21  ;;  %v680_v25 = vrot.slane %v441_v21, 4  ;;  %v678_v63 = vrot.slane %v677_v38, 1 }
 0x3b7   :  { %v681_v30 = vadd.f32 %v680_v25, %v441_v21  ;;  %v679_v50 = vadd.f32 %v678_v63, %v677_v38 }
 0x3b8   :  { %v424_v32 = vpop.f32.mrf.mxu3 }
 0x3b9   :  { %v682_v43 = vrot.slane %v681_v30, 2  ;;  %v425_v35 = vadd.f32 %v1183_v34, %v424_v32  ;;  %v719_v61 = vsel %vm579_vm5, %v679_v50, %v718_v58 }
 0x3bb   :  { %v442_v39 = vmax.f32 %v425_v35, 0.0  ;;  %v683_v41 = vadd.f32 %v682_v43, %v681_v30 }
 0x3bd   :  { %458 = vst [vmem:[#allocation5 + $0x78] sm:$0xff] %v442_v39  ;;  %v686_v51 = vrot.slane %v442_v39, 4  ;;  %v684_v1 = vrot.slane %v683_v41, 1 }
 0x3be   :  { %738 = dma.vmem_to_hbm [thread:$0]  %s731_s7, 2048, %s733_s20, [#allocation4], %s907_s10, %s907_s10, %s908_s11  }
 0x3bf   :  { %v687_v34 = vadd.f32 %v686_v51, %v442_v39  ;;  %v685_v54 = vadd.f32 %v684_v1, %v683_v41 }
 0x3c1   :  { %v688_v47 = vrot.slane %v687_v34, 2  ;;  %v720_v62 = vsel %vm581_vm6, %v685_v54, %v719_v61 }
 0x3c3   :  { %v689_v52 = vadd.f32 %v688_v47, %v687_v34 }
 0x3c5   :  { %v690_v57 = vrot.slane %v689_v52, 1 }
 0x3c7   :  { %v691_v59 = vadd.f32 %v690_v57, %v689_v52 }
 0x3c9   :  { %v721_v3 = vsel %vm583_vm7, %v691_v59, %v720_v62 }
 0x3ca   :  { %725 = vst [vmem:[#allocation8 + $0x8] sm:$0xff] %v721_v3 }
 0x3cb   :  { %764 = dma.vmem_to_hbm [thread:$0]  %s757_s2, 256, %s759_s23, [#allocation7], %s907_s10, %s907_s10, %s908_s11  }
 0x3cc   :  { %902 = dma.done.wait [#allocation4], 2048  }
 0x3cd   :  { %903 = vsyncadd [#allocation4], 4294965248 }
 0x3ce   :  { %904 = dma.done.wait [#allocation7], 512  }
 0x3cf   :  { %905 = vsyncadd [#allocation7], 4294966784 }
 0x3d0   :  { %777 = vsyncpa [#allocation3], 1 }
 0x3d1   :  { %778 = vsyncpa [#allocation4], 1 }
 0x3d2   :  { %779 = vsyncpa [#allocation7], 1 }

</bundles_post_ra>
